<compile_context>
chip_gen: v6e
topology: v6e:2x2x1
jax: 0.10.0
libtpu: 0.0.40
codegen_flags: <defaults>
</compile_context>

<pallas_src>
import jax
import jax.numpy as jnp
from jax.experimental import pallas as pl
from jax.experimental.pallas import tpu as pltpu


def _concat_kernel(in1_ref, in2_ref, out_ref):
    # in1_ref: (TB, C1, 1)   in2_ref: (TB, C2, TL)   out_ref: (TB, C1+C2, TL)
    tb, c1, _ = in1_ref.shape
    tl = in2_ref.shape[2]
    # Lane-axis broadcast of input1 (size-1 lane dim -> TL): pure VPU replication,
    # no cross-lane transpose.
    out_ref[:, :c1, :] = jnp.broadcast_to(in1_ref[...], (tb, c1, tl))
    # Straight copy of input2 below it.
    out_ref[:, c1:, :] = in2_ref[...]


def _round_up(x: int, m: int) -> int:
    return ((x + m - 1) // m) * m


def _vmem_capacity_bytes() -> int:
    """Per-TensorCore VMEM capacity; conservative fallback if the query fails."""
    try:
        info = pltpu.get_tpu_info()
        cap = getattr(info, "vmem_capacity_bytes", None)
        if cap:
            return int(cap)
    except Exception:
        pass
    return 64 * 1024 * 1024  # v7x per-TC VMEM (smallest of the supported gens)


def concatenate_layer(input1: jax.Array,
                      input2: jax.Array,
                      *,
                      block_b: int | None = None,
                      block_l: int | None = None) -> jax.Array:
    """input1: (B, C1), input2: (B, C2, L) -> (B, C1+C2, L)."""
    B, C1 = input1.shape
    B2, C2, L = input2.shape
    assert B == B2, "batch dims must match"

    out_dtype = jnp.result_type(input1.dtype, input2.dtype)
    # Unify dtypes in the wrapper so the kernel has no VPU casts.
    if input1.dtype != out_dtype:
        input1 = input1.astype(out_dtype)
    if input2.dtype != out_dtype:
        input2 = input2.astype(out_dtype)

    # Free (contiguous) reshape: makes the in-kernel broadcast a lane replication.
    input1_3d = input1.reshape(B, C1, 1)
    itemsize = jnp.dtype(out_dtype).itemsize

    # ---- generation-aware tile budget ---------------------------------------
    vmem_cap = _vmem_capacity_bytes()
    # Single-buffer per-step budget; double-buffered this is ~capacity/4, leaving
    # plenty of headroom on v5e/v6e (128 MiB) and v7x (64 MiB per TC).
    tile_budget = max(4 * 1024 * 1024, vmem_cap // 8)

    # Bytes of the (8,128)-padded in2 + out tiles per example per lane column block.
    rows_bytes = (_round_up(C2, 8) + _round_up(C1 + C2, 8)) * itemsize

    # ---- choose the L tile (multiple of 128, or full L) ----------------------
    if block_l is not None:
        TL = int(min(block_l, L))
        if TL != L:
            TL = max(128, (TL // 128) * 128)
            if TL >= L:
                TL = L
    else:
        TL = L
        if rows_bytes * _round_up(L, 128) > tile_budget and L > 128:
            affordable_cols = tile_budget // rows_bytes
            TL = max(128, (affordable_cols // 128) * 128)
            if TL >= L:
                TL = L

    per_example = rows_bytes * _round_up(TL, 128)

    # ---- choose the batch tile -----------------------------------------------
    if block_b is not None:
        TB = int(max(1, min(B, block_b)))
    else:
        TB = int(max(1, tile_budget // max(per_example, 1)))
        TB = min(TB, B)
        # Keep >= 4 batch grid steps (when B allows) so the software pipeline
        # always has HBM read and write in flight; also keeps >= 2 steps for
        # v7x megacore sharding of the "parallel" batch axis.
        TB = max(1, min(TB, -(-B // 4)))

    grid = (pl.cdiv(B, TB), pl.cdiv(L, TL))

    # ---- explicit VMEM limit sized to the real working set -------------------
    in1_tile_bytes = TB * _round_up(C1, 8) * 128 * itemsize  # lane pads 1 -> 128
    step_bytes = TB * per_example + in1_tile_bytes
    vmem_limit = 2 * step_bytes + (8 * 1024 * 1024)          # double buffers + slack
    vmem_limit = max(16 * 1024 * 1024, min(vmem_limit, vmem_cap - 4 * 1024 * 1024))

    return pl.pallas_call(
        _concat_kernel,
        out_shape=jax.ShapeDtypeStruct((B, C1 + C2, L), out_dtype),
        grid=grid,
        in_specs=[
            # input1 block is constant along the inner L axis -> fetched once per
            # batch block by the pipeline.
            pl.BlockSpec((TB, C1, 1), lambda b, l: (b, 0, 0)),
            pl.BlockSpec((TB, C2, TL), lambda b, l: (b, 0, l)),
        ],
        out_specs=pl.BlockSpec((TB, C1 + C2, TL), lambda b, l: (b, 0, l)),
        compiler_params=pltpu.CompilerParams(
            dimension_semantics=("parallel", "parallel"),
            vmem_limit_bytes=int(vmem_limit),
        ),
    )(input1_3d, input2)


def _reference(input1, input2):
    B, C1 = input1.shape
    L = input2.shape[2]
    out_dtype = jnp.result_type(input1.dtype, input2.dtype)
    x1 = jnp.broadcast_to(input1[:, :, None].astype(out_dtype), (B, C1, L))
    return jnp.concatenate([x1, input2.astype(out_dtype)], axis=-2)


if __name__ == "__main__":
    key = jax.random.PRNGKey(0)
    k1, k2, k3, k4, k5, k6 = jax.random.split(key, 6)

    # Test 1: small shapes consistent with the module (auto-chosen tiles).
    B, C1, C2, L = 2, 4, 8, 16
    input1 = jax.random.normal(k1, (B, C1), dtype=jnp.float32)
    input2 = jax.random.normal(k2, (B, C2, L), dtype=jnp.float32)

    out = concatenate_layer(input1, input2)
    out = jax.block_until_ready(out)
    ref = _reference(input1, input2)
    assert out.shape == (B, C1 + C2, L), out.shape
    assert jnp.allclose(out, ref), "mismatch vs reference (test 1)"

    # Test 2: multiple batch grid steps with a ragged final batch block (B=5, TB=2).
    B2_, C1b, C2b, Lb = 5, 8, 8, 128
    input1b = jax.random.normal(k3, (B2_, C1b), dtype=jnp.float32)
    input2b = jax.random.normal(k4, (B2_, C2b, Lb), dtype=jnp.float32)

    outb = concatenate_layer(input1b, input2b, block_b=2)
    outb = jax.block_until_ready(outb)
    refb = _reference(input1b, input2b)
    assert outb.shape == (B2_, C1b + C2b, Lb), outb.shape
    assert jnp.allclose(outb, refb), "mismatch vs reference (test 2)"

    # Test 3: exercise the L-tiling fallback path (TL=128, ragged last L block and
    # ragged last batch block).
    B3_, C1c, C2c, Lc = 3, 4, 8, 320
    input1c = jax.random.normal(k5, (B3_, C1c), dtype=jnp.float32)
    input2c = jax.random.normal(k6, (B3_, C2c, Lc), dtype=jnp.float32)

    outc = concatenate_layer(input1c, input2c, block_b=2, block_l=128)
    outc = jax.block_until_ready(outc)
    refc = _reference(input1c, input2c)
    assert outc.shape == (B3_, C1c + C2c, Lc), outc.shape
    assert jnp.allclose(outc, refc), "mismatch vs reference (test 3)"

    print("KERNEL_OK")
</pallas_src>

<mosaic_0001>
module attributes {stable_mosaic.version = 11 : i64} {
  func.func @_concat_kernel(%arg0: i32, %arg1: i32, %arg2: memref<1x4x1xf32, #tpu.memory_space<vmem>>, %arg3: memref<1x8x16xf32, #tpu.memory_space<vmem>>, %arg4: memref<1x12x16xf32, #tpu.memory_space<vmem>>) attributes {dimension_semantics = [#tpu.dimension_semantics<parallel>, #tpu.dimension_semantics<parallel>], iteration_bounds = array<i64: 2, 1>, scalar_prefetch = 0 : i64, scratch_operands = 0 : i64, tpu.core_type = #tpu.core_type<tc>, window_params = [{transform_indices = @transform_0, window_bounds = array<i64: 1, 4, 1>}, {transform_indices = @transform_1, window_bounds = array<i64: 1, 8, 16>}, {transform_indices = @transform_2, window_bounds = array<i64: 1, 12, 16>}]} {
    %c0 = arith.constant 0 : index
    %c0_0 = arith.constant 0 : index
    %c0_1 = arith.constant 0 : index
    %0 = vector.load %arg2[%c0, %c0_0, %c0_1] : memref<1x4x1xf32, #tpu.memory_space<vmem>>, vector<1x4x1xf32>
    %1 = vector.shape_cast %0 : vector<1x4x1xf32> to vector<1x4x1xf32>
    %2 = vector.broadcast %1 : vector<1x4x1xf32> to vector<1x4x16xf32>
    %c0_2 = arith.constant 0 : index
    %c0_3 = arith.constant 0 : index
    %c0_4 = arith.constant 0 : index
    %3 = vector.load %arg4[%c0_2, %c0_3, %c0_4] : memref<1x12x16xf32, #tpu.memory_space<vmem>>, vector<1x4x16xf32>
    tpu.vector_store %arg4[%c0_2, %c0_3, %c0_4], %2 {strides = array<i32>} : memref<1x12x16xf32, #tpu.memory_space<vmem>>, vector<1x4x16xf32>,
    %c0_5 = arith.constant 0 : index
    %c0_6 = arith.constant 0 : index
    %c0_7 = arith.constant 0 : index
    %4 = vector.load %arg3[%c0_5, %c0_6, %c0_7] : memref<1x8x16xf32, #tpu.memory_space<vmem>>, vector<1x8x16xf32>
    %c0_8 = arith.constant 0 : index
    %c4 = arith.constant 4 : index
    %c0_9 = arith.constant 0 : index
    %5 = vector.load %arg4[%c0_8, %c4, %c0_9] : memref<1x12x16xf32, #tpu.memory_space<vmem>>, vector<1x8x16xf32>
    tpu.vector_store %arg4[%c0_8, %c4, %c0_9], %4 {strides = array<i32>} : memref<1x12x16xf32, #tpu.memory_space<vmem>>, vector<1x8x16xf32>,
    return
  }
  func.func @transform_0(%arg0: i32, %arg1: i32) -> (i32, i32, i32) {
    %c0_i32 = arith.constant 0 : i32
    %c0_i32_0 = arith.constant 0 : i32
    %c0_i32_1 = arith.constant 0 : i32
    return %arg0, %c0_i32, %c0_i32_0 : i32, i32, i32
  }
  func.func @transform_1(%arg0: i32, %arg1: i32) -> (i32, i32, i32) {
    %c0_i32 = arith.constant 0 : i32
    %c0_i32_0 = arith.constant 0 : i32
    return %arg0, %c0_i32, %arg1 : i32, i32, i32
  }
  func.func @transform_2(%arg0: i32, %arg1: i32) -> (i32, i32, i32) {
    %c0_i32 = arith.constant 0 : i32
    %c0_i32_0 = arith.constant 0 : i32
    return %arg0, %c0_i32, %arg1 : i32, i32, i32
  }
}

</mosaic_0001>

<bundles_post_ra>
// kernel: tpu_custom_call.1
= control target key start
LH: loop header
LB: loop body
LE: loop exit
PB: predicated region body
PF: predicated region fallthrough
CT: control target
= control target key end

     0   :  { %7 = vsyncpa [#allocation3], 0  ;;  %s585_s0 = inlined_call_operand.vmem [shape: f32[2,4,1], index: 0, kind: input, shape index: {}]   ;;  %s586_s1 = inlined_call_operand.hbm [shape: f32[2,8,16], index: 1, kind: input, shape index: {}]   ;;  %s587_s2 = inlined_call_operand.vmem [shape: f32[2,12,16], index: 2, kind: output, shape index: {}]  }
   0x1   :  { %9 = vsyncpa [#allocation3 + $0x1], 0  ;;  %s482_s9 = smov 0   ;;  %s484_s10 = smov 0  }
   0x2   :  { %s486_s11 = smov 0   ;;  %s488_s12 = smov 0  }
   0x3   :  { %s490_s13 = smov 0   ;;  %s492_s14 = smov 0  }
   0x4 LB: > { %s314_s15 = sadd.s32 4294967295, %s463_s14   ;;  %s27_s16 = sadd.s32 1, %s459_s13  ;;  %s463_s14 = sphi %s492_s14, %s15_s14   ;;  %s459_s13 = sphi %s490_s13, %s595_s13   ;;  %s455_s12 = sphi %s488_s12, %s594_s12   ;;  %s451_s11 = sphi %s486_s11, %s593_s11   ;;  %s447_s10 = sphi %s484_s10, %s592_s10   ;;  %s443_s9 = sphi %s482_s9, %s591_s9  }
   0x5   : > { %p29_p0 = scmp.ge.s32.totalorder %s27_s16, 2  ;;  %s62_s17 = sadd.s32 1, %s451_s11 }
   0x6   : > { %p69_p1 = scmp.ne.s32.totalorder %s451_s11, %s447_s10  ;;  %p70_p2 = scmp.eq.s32.totalorder %s463_s14, 0 }
   0x7   : > { %s597_s16 = smov (%p29_p0, %s27_s16), 0  ;;  %p75_p4 = scmp.ne.s32.totalorder %s447_s10, %s443_s9 }
   0x8   : > { %p518_p3 = por %p70_p2, %p69_p1  ;;  %s57_s19 = ssub.s32 %s459_s13, %s597_s16 }
   0x9   : > { %p76_p5 = scmp.eq.s32.totalorder %s314_s15, 0  ;;  %p60_p6 = scmp.eq.s32.totalorder %s57_s19, 0 }
   0xa   : > { %p334_p8 = scmp.lt.s32.totalorder %s463_s14, 2  ;;  %s134_s22 = sand.u32 1, %s451_s11  }
   0xb   : > { %p525_p7 = por %p76_p5, %p75_p4  ;;  %s319_s23 = sshll.u32 %s459_s13, 7 }
   0xc   : > { %s531_s21 = scalar_select %p60_p6, %s451_s11, %s62_s17  }
   0xd   : > { %s318_s24 = sshll.u32 %s134_s22, 3  ;;  %s144_s27 = scalar_lea.hbm %s586_s1, %s319_s23 }
   0xe   : > { %s138_s28 = scalar_lea.vmem [#allocation2], %s318_s24  ;;  %p540_p9 = pnand %p334_p8, %p518_p3 }
   0xf   : > { %s146_s29 = sshll.u32 %s138_s28, 4  ;;  %p320_p10 = scmp.ge.s32.totalorder %s463_s14, 1  ;;  %s147_s29 = int_to_ptr.vmem [resolvable:$true] %s146_s29 }
  0x10   : > { %p151_p11 = scmp.lt.s32.totalorder %s463_s14, 3  ;;  %s135_s3 = scalar_lea.sflag [#allocation3], %s134_s22 }
  0x11   : > { %p387_p12 = pneg %p540_p9  ;;  %s398_s4 = scalar_lea.vmem %s147_s29, 128 }
  0x12   : > { %p399_p13 = scmp.ne.s32.totalorder %s147_s29, %s398_s4  ;;  %s465_s5 = smov [#allocation2]  }
  0x13   : > { %s403_s6 = sshll.u32 %s465_s5, 4  ;;  %s404_s6 = int_to_ptr.vmem [resolvable:$false] %s403_s6 }
  0x14   : > { %p401_p0 = pnand %p399_p13, %p387_p12  ;;  %s405_s7 = scalar_lea.vmem %s404_s6, 256 }
  0x15   : > { %p406_p2 = scmp.lt.s32.totalorder %s147_s29, %s404_s6  ;;  %p407_p3 = scmp.lt.s32.totalorder %s405_s7, %s398_s4 }
  0x16   : > { %p402_p1 = pneg %p401_p0 }
  0x17   : > { %p408_p4 = por %p407_p3, %p406_p2 }
  0x19   : > { %p409_p5 = pnand %p408_p4, %p402_p1 }
  0x1b   : > { %412 = shalt.err (!%p409_p5)
}
  0x1c   : > { %333 = dma.hbm_to_vmem [thread:$0]  (!%p540_p9), %s144_s27, 128, %s147_s29, %s135_s3  }
  0x1d   : > { %p152_p6 = pnand %p320_p10, %p151_p11 }
  0x1e   : > { %s157_s8 = sand.u32 (!%p152_p6), 1, %s447_s10  }
  0x1f   : > { %155 = sbr.rel (%p152_p6) target bundleno = 168 (0xa8), region = 28  ;;  %s321_s9 = sshll.u32 (!%p152_p6), %s157_s8, 3 }
  0x20   : > { %s158_s15 = scalar_lea.sflag (!%p152_p6), [#allocation3], %s157_s8  ;;  %s161_s17 = scalar_lea.vmem (!%p152_p6), [#allocation2], %s321_s9 }
  0x24   : > { %438 = dma.done.wait (%p525_p7), %s158_s15, 128  }
  0x25   : > { %440 = vsyncadd (%p525_p7), %s158_s15, 4294967168  ;;  %p189_p8 = scmp.lt.s32.totalorder %s455_s12, 1  ;;  %v466_v0 = vmov 0   ;;  %vm210_vm0 = vcmask 130048   ;;  %v209_v1 = vld [vmem:[%s161_s17] sm:$0xff]  ;;  %vm207_vm1 = vcmask 125952  }
  0x26   : > { %384 = vset.pattern.permute.xlu0 %v466_v0 }
  0x27   : > { %s599_s12 = smov (!%p189_p8, %s455_s12), 1 }
  0x28   : > { %s327_s18 = sshll.u32 %s599_s12, 4  ;;  %s322_s19 = sshll.u32 %s599_s12, 2 }
  0x29   : > { %s200_s24 = scalar_lea.vmem %s587_s2, %s327_s18  ;;  %s192_s27 = scalar_lea.vmem %s585_s0, %s322_s19 }
  0x2a   : > { %v201_v2 = vld [vmem:[%s192_s27] sm:$0xf]  ;;  %211 = vst.msk [vmem:[%s200_s24 + $0x4] sm:$0xff] %vm210_vm0, %v209_v1 }
  0x2b   : > { %204 = vperm.xlu0 %384, %v201_v2  }
  0xa6   : > { %v205_v3 = vpop.permute.xlu0 %204 }
  0xa7   : > { %208 = vst.msk [vmem:[%s200_s24] sm:$0xf] %vm207_vm1, %v205_v3 }
  0xa8 PF: > { %s15_s14 = sadd.s32 1, %s463_s14   ;;  %s591_s9 = smov %s447_s10 }
  0xa9   : > { %p12_p7 = scmp.ge.s32.totalorder %s15_s14, 4   ;;  %s592_s10 = smov %s451_s11 }
  0xaa   : > { %s593_s11 = smov %s531_s21  ;;  %s594_s12 = smov %s459_s13 }
  0xab   : > { %s595_s13 = smov %s597_s16  ;;  %14 = sbr.rel (!%p12_p7) target bundleno = 4 (0x4), region = 71 }
  0xb0   :  { %239 = vsyncpa [#allocation3], 1 }
  0xb1   :  { %241 = vsyncpa [#allocation3 + $0x1], 1 }

</bundles_post_ra>
